<compile_context>
chip_gen: v7x
topology: tpu7x:2x2x1
jax: 0.10.0
libtpu: 0.0.40
codegen_flags: <defaults>
</compile_context>

<pallas_src>
import functools

import jax
import jax.numpy as jnp
from jax.experimental import pallas as pl
from jax.experimental.pallas import tpu as pltpu

SLOPE = 0.2  # LeakyReLU negative slope (matches nn.LeakyReLU(0.2))


def _round_up(n, m):
    return ((n + m - 1) // m) * m


def _pad_rows(a, m):
    pad = (-a.shape[0]) % m
    if pad:
        a = jnp.pad(a, ((0, pad),) + ((0, 0),) * (a.ndim - 1))
    return a


def _lrelu(h):
    return jnp.where(h > 0, h, SLOPE * h)


def _mm(a, b, matmul_dtype):
    if matmul_dtype is not None:
        a = a.astype(matmul_dtype)
        b = b.astype(matmul_dtype)
    return jnp.dot(a, b, preferred_element_type=jnp.float32)


# ----------------------------------------------------------------------------
# fc MLP kernel: embedding_dim -> hidden (x3 LeakyReLU) -> hidden, row-tiled.
# ----------------------------------------------------------------------------
def fc_mlp_kernel(x_ref, w1, b1, w2, b2, w3, b3, w4, b4, o_ref, *, matmul_dtype):
    h = _lrelu(_mm(x_ref[...], w1[...], matmul_dtype) + b1[...])
    h = _lrelu(_mm(h, w2[...], matmul_dtype) + b2[...])
    h = _lrelu(_mm(h, w3[...], matmul_dtype) + b3[...])
    o_ref[...] = _mm(h, w4[...], matmul_dtype) + b4[...]


def fc_mlp(x, params, matmul_dtype=None, tile_m=512):
    n, d_in = x.shape
    hidden = params[-2].shape[-1]
    tm = min(tile_m, _round_up(n, 8))
    xp = _pad_rows(x, tm)
    n_pad = xp.shape[0]
    kernel = functools.partial(fc_mlp_kernel, matmul_dtype=matmul_dtype)
    out = pl.pallas_call(
        kernel,
        grid=(n_pad // tm,),
        in_specs=[pl.BlockSpec((tm, d_in), lambda i: (i, 0))]
        + [pl.BlockSpec(p.shape, lambda i: (0, 0)) for p in params],  # resident weights
        out_specs=pl.BlockSpec((tm, hidden), lambda i: (i, 0)),
        out_shape=jax.ShapeDtypeStruct((n_pad, hidden), jnp.float32),
        compiler_params=pltpu.CompilerParams(dimension_semantics=("parallel",)),
    )(xp, *params)
    return out[:n]


# ----------------------------------------------------------------------------
# Fused per-latent g MLPs: one block-diagonal MLP of width L*H.
# Computes residuals (N, L) and log|d g_i / d x_t,i| (N, L) in one pass;
# the value path and the forward-mode tangent path share each MXU weight push.
# ----------------------------------------------------------------------------
def g_fused_kernel(inp_ref, w1, t1, b1, w2, b2, w3, b3, w4, b4,
                   res_ref, ld_ref, *, matmul_dtype):
    x = inp_ref[...]
    n = x.shape[0]

    # layer 1: value; tangent seed is the constant last-row of each W1_i (t1)
    h1 = _mm(x, w1[...], matmul_dtype) + b1[...]
    d1 = jnp.where(h1 > 0, 1.0, SLOPE)
    a1, ta1 = d1 * h1, d1 * t1[...]

    # layer 2: one fused (2n, LH) @ (LH, LH) dot carries value + tangent
    z = _mm(jnp.concatenate([a1, ta1], axis=0), w2[...], matmul_dtype)
    h2 = z[:n] + b2[...]
    d2 = jnp.where(h2 > 0, 1.0, SLOPE)
    a2, ta2 = d2 * h2, d2 * z[n:]

    # layer 3
    z = _mm(jnp.concatenate([a2, ta2], axis=0), w3[...], matmul_dtype)
    h3 = z[:n] + b3[...]
    d3 = jnp.where(h3 > 0, 1.0, SLOPE)
    a3, ta3 = d3 * h3, d3 * z[n:]

    # output layer: (2n, LH) @ (LH, L)
    z = _mm(jnp.concatenate([a3, ta3], axis=0), w4[...], matmul_dtype)
    res_ref[...] = z[:n] + b4[...]
    ld_ref[...] = jnp.log(jnp.abs(z[n:]))


def g_fused(inp, fused_params, latent_size, matmul_dtype=None, tile_n=512):
    n_rows, d_in = inp.shape
    tn = min(tile_n, _round_up(n_rows, 8))
    xp = _pad_rows(inp, tn)
    n_pad = xp.shape[0]
    kernel = functools.partial(g_fused_kernel, matmul_dtype=matmul_dtype)
    res, ld = pl.pallas_call(
        kernel,
        grid=(n_pad // tn,),
        in_specs=[pl.BlockSpec((tn, d_in), lambda i: (i, 0))]
        + [pl.BlockSpec(p.shape, lambda i: (0, 0)) for p in fused_params],  # resident
        out_specs=[
            pl.BlockSpec((tn, latent_size), lambda i: (i, 0)),
            pl.BlockSpec((tn, latent_size), lambda i: (i, 0)),
        ],
        out_shape=[
            jax.ShapeDtypeStruct((n_pad, latent_size), jnp.float32),
            jax.ShapeDtypeStruct((n_pad, latent_size), jnp.float32),
        ],
        compiler_params=pltpu.CompilerParams(dimension_semantics=("parallel",)),
    )(xp, *fused_params)
    return res[:n_rows], ld[:n_rows]


def fuse_g_params(g_params):
    """Stack the L per-latent MLPs into one block-diagonal MLP of width L*H."""
    W1s, b1s, W2s, b2s, W3s, b3s, W4s, b4s = g_params
    L, d_in, H = W1s.shape
    D_b = d_in - 1  # shared-base input dim (everything except the x_t scalar)
    eye = jnp.eye(L, dtype=W1s.dtype)

    # layer 1: shared-base rows stacked along output; per-latent x_t row becomes
    # a (L, L*H) selector so the fused input is [base, x_t_0..x_t_{L-1}].
    W1_base = jnp.transpose(W1s[:, :D_b, :], (1, 0, 2)).reshape(D_b, L * H)
    last = W1s[:, D_b, :]                                           # (L, H)
    W1_xt = (eye[:, :, None] * last[None, :, :]).reshape(L, L * H)
    W1f = jnp.concatenate([W1_base, W1_xt], axis=0)                 # (D_b + L, L*H)
    t1 = last.reshape(1, L * H)                                     # tangent seed
    b1f = b1s.reshape(1, L * H)

    def block_diag(Ws):                                             # (L,H,H)->(LH,LH)
        return (eye[:, None, :, None] * Ws[:, :, None, :]).reshape(L * H, L * H)

    W2f, W3f = block_diag(W2s), block_diag(W3s)
    b2f, b3f = b2s.reshape(1, L * H), b3s.reshape(1, L * H)
    W4f = (eye[:, None, :] * W4s[:, :, 0][:, :, None]).reshape(L * H, L)
    b4f = b4s.reshape(1, L)
    return (W1f, t1, b1f, W2f, b2f, W3f, b3f, W4f, b4f)


# ----------------------------------------------------------------------------
# Full forward, mirroring NPChangeTransitionPrior.forward
# ----------------------------------------------------------------------------
def np_change_transition_prior_forward(x, embeddings, fc_params, g_params, lags,
                                       matmul_dtype=None):
    batch, lags_and_length, x_dim = x.shape
    length = lags_and_length - lags
    latent_size = x_dim
    hidden_dim = fc_params[-2].shape[-1]

    x = x.astype(jnp.float32)

    # embeddings = self.fc(embeddings)  (row-tiled Pallas MLP)
    emb_flat = embeddings.reshape(batch * lags_and_length, -1).astype(jnp.float32)
    emb_out = fc_mlp(emb_flat, fc_params, matmul_dtype)
    emb_out = emb_out.reshape(batch, lags_and_length, hidden_dim)
    batch_embeddings = emb_out[:, -length:].reshape(batch * length, hidden_dim)

    # x.unfold(1, lags+1, 1): `lags` overlapping slices instead of `length` copies
    x_lags = jnp.concatenate([x[:, j:j + length, :] for j in range(lags)], axis=-1)
    batch_x_lags = x_lags.reshape(batch * length, lags * x_dim)
    batch_x_t = x[:, lags:, :].reshape(batch * length, x_dim)

    # shared base built once; all x_t columns appended (per-latent selection is
    # folded into the fused layer-1 weight) -> single (N, D) kernel input
    inp = jnp.concatenate([batch_embeddings, batch_x_lags, batch_x_t], axis=-1)

    fused = fuse_g_params(g_params)
    res, ld = g_fused(inp, fused, latent_size, matmul_dtype)

    residuals = res.reshape(batch, length, latent_size)
    log_abs_det_jacobian = jnp.sum(ld, axis=-1).reshape(batch, length)
    return residuals, log_abs_det_jacobian


# ----------------------------------------------------------------------------
# Pure-JAX reference (mirrors the torch module with vmap(jacfwd)).
# ----------------------------------------------------------------------------
def _reference_forward(x, embeddings, fc_params, g_params, lags):
    def mlp(params, v):
        w1, b1, w2, b2, w3, b3, w4, b4 = params
        h = _lrelu(v @ w1 + b1[0])
        h = _lrelu(h @ w2 + b2[0])
        h = _lrelu(h @ w3 + b3[0])
        return h @ w4 + b4[0]

    batch, lal, d = x.shape
    length = lal - lags
    emb = mlp(fc_params, embeddings.reshape(batch * lal, -1))
    emb = emb.reshape(batch, lal, -1)[:, -length:].reshape(batch * length, -1)
    x_lags = jnp.concatenate([x[:, j:j + length, :] for j in range(lags)],
                             axis=-1).reshape(batch * length, lags * d)
    x_t = x[:, lags:, :].reshape(batch * length, d)

    res_cols = []
    ld_sum = jnp.zeros((batch * length,), jnp.float32)
    for i in range(d):
        gi = tuple(p[i] for p in g_params)
        inp = jnp.concatenate([emb, x_lags, x_t[:, i:i + 1]], axis=-1)
        g_fn = lambda v, gi=gi: mlp(gi, v[None, :])[0, 0]
        res_cols.append(jax.vmap(g_fn)(inp))
        jac = jax.vmap(jax.jacfwd(g_fn))(inp)          # (N, D_in)
        ld_sum = ld_sum + jnp.log(jnp.abs(jac[:, -1]))
    residuals = jnp.stack(res_cols, axis=-1).reshape(batch, length, d)
    return residuals, ld_sum.reshape(batch, length)


# ----------------------------------------------------------------------------
# Deterministic parameter construction (synthetic init; shapes from __init__)
# ----------------------------------------------------------------------------
def init_params(key, lags, latent_size, embedding_dim, hidden_dim):
    d_in_g = hidden_dim + lags * latent_size + 1

    def mk(key, shape, scale=0.1):
        return scale * jax.random.normal(key, shape, dtype=jnp.float32)

    keys = jax.random.split(key, 16)
    fc_params = (
        mk(keys[0], (embedding_dim, hidden_dim)), mk(keys[1], (1, hidden_dim)),
        mk(keys[2], (hidden_dim, hidden_dim)),    mk(keys[3], (1, hidden_dim)),
        mk(keys[4], (hidden_dim, hidden_dim)),    mk(keys[5], (1, hidden_dim)),
        mk(keys[6], (hidden_dim, hidden_dim)),    mk(keys[7], (1, hidden_dim)),
    )
    g_params = (
        mk(keys[8],  (latent_size, d_in_g, hidden_dim)),
        mk(keys[9],  (latent_size, 1, hidden_dim)),
        mk(keys[10], (latent_size, hidden_dim, hidden_dim)),
        mk(keys[11], (latent_size, 1, hidden_dim)),
        mk(keys[12], (latent_size, hidden_dim, hidden_dim)),
        mk(keys[13], (latent_size, 1, hidden_dim)),
        mk(keys[14], (latent_size, hidden_dim, 1)),
        mk(keys[15], (latent_size, 1, 1)),
    )
    return fc_params, g_params


if __name__ == "__main__":
    lags = 2
    latent_size = 4          # == x_dim ; latent_size*hidden = 128 lanes
    embedding_dim = 8
    hidden_dim = 32
    batch = 2
    length = 8
    lags_and_length = length + lags

    key = jax.random.PRNGKey(0)
    kx, ke, kp = jax.random.split(key, 3)
    x = jax.random.normal(kx, (batch, lags_and_length, latent_size), dtype=jnp.float32)
    embeddings = jax.random.normal(ke, (batch, lags_and_length, embedding_dim),
                                   dtype=jnp.float32)
    fc_params, g_params = init_params(kp, lags, latent_size, embedding_dim, hidden_dim)

    residuals, log_abs_det = np_change_transition_prior_forward(
        x, embeddings, fc_params, g_params, lags)
    jax.block_until_ready((residuals, log_abs_det))

    assert residuals.shape == (batch, length, latent_size)
    assert log_abs_det.shape == (batch, length)

    # Sanity-check against a pure-JAX vmap(jacfwd) reference (loose tolerances
    # to absorb MXU vs XLA matmul rounding; log|J| check tolerates the rare
    # LeakyReLU-kink sign flip at h ~ 0).
    ref_res, ref_ld = _reference_forward(x, embeddings, fc_params, g_params, lags)
    assert bool(jnp.allclose(residuals, ref_res, rtol=2e-2, atol=2e-3)), "residual mismatch"
    ld_close = jnp.isclose(log_abs_det, ref_ld, rtol=2e-2, atol=2e-2)
    assert float(jnp.mean(ld_close)) >= 0.9, "log|det J| mismatch"

    print("KERNEL_OK")
</pallas_src>

<mosaic_0001>
module attributes {stable_mosaic.version = 11 : i64} {
  func.func @fc_mlp_kernel(%arg0: i32, %arg1: memref<24x8xf32, #tpu.memory_space<vmem>>, %arg2: memref<8x32xf32, #tpu.memory_space<vmem>>, %arg3: memref<1x32xf32, #tpu.memory_space<vmem>>, %arg4: memref<32x32xf32, #tpu.memory_space<vmem>>, %arg5: memref<1x32xf32, #tpu.memory_space<vmem>>, %arg6: memref<32x32xf32, #tpu.memory_space<vmem>>, %arg7: memref<1x32xf32, #tpu.memory_space<vmem>>, %arg8: memref<32x32xf32, #tpu.memory_space<vmem>>, %arg9: memref<1x32xf32, #tpu.memory_space<vmem>>, %arg10: memref<24x32xf32, #tpu.memory_space<vmem>>) attributes {dimension_semantics = [#tpu.dimension_semantics<parallel>], iteration_bounds = array<i64: 1>, scalar_prefetch = 0 : i64, scratch_operands = 0 : i64, tpu.core_type = #tpu.core_type<tc>, window_params = [{transform_indices = @transform_0, window_bounds = array<i64: 24, 8>}, {pipeline_mode = #tpu.pipeline_mode<synchronous>, transform_indices = @transform_1, window_bounds = array<i64: 8, 32>}, {pipeline_mode = #tpu.pipeline_mode<synchronous>, transform_indices = @transform_2, window_bounds = array<i64: 1, 32>}, {pipeline_mode = #tpu.pipeline_mode<synchronous>, transform_indices = @transform_3, window_bounds = array<i64: 32, 32>}, {pipeline_mode = #tpu.pipeline_mode<synchronous>, transform_indices = @transform_4, window_bounds = array<i64: 1, 32>}, {pipeline_mode = #tpu.pipeline_mode<synchronous>, transform_indices = @transform_5, window_bounds = array<i64: 32, 32>}, {pipeline_mode = #tpu.pipeline_mode<synchronous>, transform_indices = @transform_6, window_bounds = array<i64: 1, 32>}, {pipeline_mode = #tpu.pipeline_mode<synchronous>, transform_indices = @transform_7, window_bounds = array<i64: 32, 32>}, {pipeline_mode = #tpu.pipeline_mode<synchronous>, transform_indices = @transform_8, window_bounds = array<i64: 1, 32>}, {transform_indices = @transform_9, window_bounds = array<i64: 24, 32>}]} {
    %c0 = arith.constant 0 : index
    %c0_0 = arith.constant 0 : index
    %0 = vector.load %arg1[%c0, %c0_0] : memref<24x8xf32, #tpu.memory_space<vmem>>, vector<24x8xf32>
    %c0_1 = arith.constant 0 : index
    %c0_2 = arith.constant 0 : index
    %1 = vector.load %arg2[%c0_1, %c0_2] : memref<8x32xf32, #tpu.memory_space<vmem>>, vector<8x32xf32>
    %cst = arith.constant dense<0.000000e+00> : vector<24x32xf32>
    %2 = tpu.matmul %0, %1, %cst {dimension_numbers = #tpu.dot_dimension_numbers<[1], [0], [0], [1], [0, 0, 1, 1], [], []>} : vector<24x8xf32>, vector<8x32xf32>, vector<24x32xf32> -> vector<24x32xf32>
    %c0_3 = arith.constant 0 : index
    %c0_4 = arith.constant 0 : index
    %3 = vector.load %arg3[%c0_3, %c0_4] : memref<1x32xf32, #tpu.memory_space<vmem>>, vector<1x32xf32>
    %4 = vector.broadcast %3 : vector<1x32xf32> to vector<24x32xf32>
    %5 = arith.addf %2, %4 : vector<24x32xf32>
    %cst_5 = arith.constant 0.000000e+00 : f32
    %6 = vector.broadcast %cst_5 : f32 to vector<24x32xf32>
    %7 = arith.cmpf ogt, %5, %6 : vector<24x32xf32>
    %cst_6 = arith.constant 2.000000e-01 : f32
    %8 = vector.broadcast %cst_6 : f32 to vector<24x32xf32>
    %9 = arith.mulf %8, %5 : vector<24x32xf32>
    %10 = arith.select %7, %5, %9 : vector<24x32xi1>, vector<24x32xf32>
    %c0_7 = arith.constant 0 : index
    %c0_8 = arith.constant 0 : index
    %11 = vector.load %arg4[%c0_7, %c0_8] : memref<32x32xf32, #tpu.memory_space<vmem>>, vector<32x32xf32>
    %cst_9 = arith.constant dense<0.000000e+00> : vector<24x32xf32>
    %12 = tpu.matmul %10, %11, %cst_9 {dimension_numbers = #tpu.dot_dimension_numbers<[1], [0], [0], [1], [0, 0, 1, 1], [], []>} : vector<24x32xf32>, vector<32x32xf32>, vector<24x32xf32> -> vector<24x32xf32>
    %c0_10 = arith.constant 0 : index
    %c0_11 = arith.constant 0 : index
    %13 = vector.load %arg5[%c0_10, %c0_11] : memref<1x32xf32, #tpu.memory_space<vmem>>, vector<1x32xf32>
    %14 = vector.broadcast %13 : vector<1x32xf32> to vector<24x32xf32>
    %15 = arith.addf %12, %14 : vector<24x32xf32>
    %cst_12 = arith.constant 0.000000e+00 : f32
    %16 = vector.broadcast %cst_12 : f32 to vector<24x32xf32>
    %17 = arith.cmpf ogt, %15, %16 : vector<24x32xf32>
    %cst_13 = arith.constant 2.000000e-01 : f32
    %18 = vector.broadcast %cst_13 : f32 to vector<24x32xf32>
    %19 = arith.mulf %18, %15 : vector<24x32xf32>
    %20 = arith.select %17, %15, %19 : vector<24x32xi1>, vector<24x32xf32>
    %c0_14 = arith.constant 0 : index
    %c0_15 = arith.constant 0 : index
    %21 = vector.load %arg6[%c0_14, %c0_15] : memref<32x32xf32, #tpu.memory_space<vmem>>, vector<32x32xf32>
    %cst_16 = arith.constant dense<0.000000e+00> : vector<24x32xf32>
    %22 = tpu.matmul %20, %21, %cst_16 {dimension_numbers = #tpu.dot_dimension_numbers<[1], [0], [0], [1], [0, 0, 1, 1], [], []>} : vector<24x32xf32>, vector<32x32xf32>, vector<24x32xf32> -> vector<24x32xf32>
    %c0_17 = arith.constant 0 : index
    %c0_18 = arith.constant 0 : index
    %23 = vector.load %arg7[%c0_17, %c0_18] : memref<1x32xf32, #tpu.memory_space<vmem>>, vector<1x32xf32>
    %24 = vector.broadcast %23 : vector<1x32xf32> to vector<24x32xf32>
    %25 = arith.addf %22, %24 : vector<24x32xf32>
    %cst_19 = arith.constant 0.000000e+00 : f32
    %26 = vector.broadcast %cst_19 : f32 to vector<24x32xf32>
    %27 = arith.cmpf ogt, %25, %26 : vector<24x32xf32>
    %cst_20 = arith.constant 2.000000e-01 : f32
    %28 = vector.broadcast %cst_20 : f32 to vector<24x32xf32>
    %29 = arith.mulf %28, %25 : vector<24x32xf32>
    %30 = arith.select %27, %25, %29 : vector<24x32xi1>, vector<24x32xf32>
    %c0_21 = arith.constant 0 : index
    %c0_22 = arith.constant 0 : index
    %31 = vector.load %arg8[%c0_21, %c0_22] : memref<32x32xf32, #tpu.memory_space<vmem>>, vector<32x32xf32>
    %cst_23 = arith.constant dense<0.000000e+00> : vector<24x32xf32>
    %32 = tpu.matmul %30, %31, %cst_23 {dimension_numbers = #tpu.dot_dimension_numbers<[1], [0], [0], [1], [0, 0, 1, 1], [], []>} : vector<24x32xf32>, vector<32x32xf32>, vector<24x32xf32> -> vector<24x32xf32>
    %c0_24 = arith.constant 0 : index
    %c0_25 = arith.constant 0 : index
    %33 = vector.load %arg9[%c0_24, %c0_25] : memref<1x32xf32, #tpu.memory_space<vmem>>, vector<1x32xf32>
    %34 = vector.broadcast %33 : vector<1x32xf32> to vector<24x32xf32>
    %35 = arith.addf %32, %34 : vector<24x32xf32>
    %c0_26 = arith.constant 0 : index
    %c0_27 = arith.constant 0 : index
    %36 = vector.load %arg10[%c0_26, %c0_27] : memref<24x32xf32, #tpu.memory_space<vmem>>, vector<24x32xf32>
    tpu.vector_store %arg10[%c0_26, %c0_27], %35 {strides = array<i32>} : memref<24x32xf32, #tpu.memory_space<vmem>>, vector<24x32xf32>,
    return
  }
  func.func @transform_0(%arg0: i32) -> (i32, i32) {
    %c0_i32 = arith.constant 0 : i32
    %c0_i32_0 = arith.constant 0 : i32
    return %arg0, %c0_i32 : i32, i32
  }
  func.func @transform_1(%arg0: i32) -> (i32, i32) {
    %c0_i32 = arith.constant 0 : i32
    %c0_i32_0 = arith.constant 0 : i32
    %c0_i32_1 = arith.constant 0 : i32
    return %c0_i32, %c0_i32_0 : i32, i32
  }
  func.func @transform_2(%arg0: i32) -> (i32, i32) {
    %c0_i32 = arith.constant 0 : i32
    %c0_i32_0 = arith.constant 0 : i32
    %c0_i32_1 = arith.constant 0 : i32
    return %c0_i32, %c0_i32_0 : i32, i32
  }
  func.func @transform_3(%arg0: i32) -> (i32, i32) {
    %c0_i32 = arith.constant 0 : i32
    %c0_i32_0 = arith.constant 0 : i32
    %c0_i32_1 = arith.constant 0 : i32
    return %c0_i32, %c0_i32_0 : i32, i32
  }
  func.func @transform_4(%arg0: i32) -> (i32, i32) {
    %c0_i32 = arith.constant 0 : i32
    %c0_i32_0 = arith.constant 0 : i32
    %c0_i32_1 = arith.constant 0 : i32
    return %c0_i32, %c0_i32_0 : i32, i32
  }
  func.func @transform_5(%arg0: i32) -> (i32, i32) {
    %c0_i32 = arith.constant 0 : i32
    %c0_i32_0 = arith.constant 0 : i32
    %c0_i32_1 = arith.constant 0 : i32
    return %c0_i32, %c0_i32_0 : i32, i32
  }
  func.func @transform_6(%arg0: i32) -> (i32, i32) {
    %c0_i32 = arith.constant 0 : i32
    %c0_i32_0 = arith.constant 0 : i32
    %c0_i32_1 = arith.constant 0 : i32
    return %c0_i32, %c0_i32_0 : i32, i32
  }
  func.func @transform_7(%arg0: i32) -> (i32, i32) {
    %c0_i32 = arith.constant 0 : i32
    %c0_i32_0 = arith.constant 0 : i32
    %c0_i32_1 = arith.constant 0 : i32
    return %c0_i32, %c0_i32_0 : i32, i32
  }
  func.func @transform_8(%arg0: i32) -> (i32, i32) {
    %c0_i32 = arith.constant 0 : i32
    %c0_i32_0 = arith.constant 0 : i32
    %c0_i32_1 = arith.constant 0 : i32
    return %c0_i32, %c0_i32_0 : i32, i32
  }
  func.func @transform_9(%arg0: i32) -> (i32, i32) {
    %c0_i32 = arith.constant 0 : i32
    %c0_i32_0 = arith.constant 0 : i32
    return %arg0, %c0_i32 : i32, i32
  }
}

</mosaic_0001>

<bundles_post_ra>
// kernel: tpu_custom_call.1
= control target key start
LH: loop header
LB: loop body
LE: loop exit
PB: predicated region body
PF: predicated region fallthrough
CT: control target
= control target key end

     0   :  { %14 = vsyncpa [#allocation3], 0  ;;  %s897_s0 = inlined_call_operand.vmem [shape: f32[24,8], index: 0, kind: input, shape index: {}]   ;;  %s898_s1 = inlined_call_operand.vmem [shape: f32[8,32], index: 1, kind: input, shape index: {}]   ;;  %s899_s2 = inlined_call_operand.vmem [shape: f32[1,32], index: 2, kind: input, shape index: {}]   ;;  %s900_s3 = inlined_call_operand.vmem [shape: f32[32,32], index: 3, kind: input, shape index: {}]   ;;  %s901_s4 = inlined_call_operand.vmem [shape: f32[1,32], index: 4, kind: input, shape index: {}]   ;;  %s902_s5 = inlined_call_operand.hbm [shape: f32[32,32], index: 5, kind: input, shape index: {}]   ;;  %s903_s6 = inlined_call_operand.vmem [shape: f32[1,32], index: 6, kind: input, shape index: {}]   ;;  %s904_s7 = inlined_call_operand.hbm [shape: f32[32,32], index: 7, kind: input, shape index: {}]   ;;  %s905_s8 = inlined_call_operand.vmem [shape: f32[1,32], index: 8, kind: input, shape index: {}]   ;;  %s906_s9 = inlined_call_operand.hbm [shape: f32[24,32], index: 9, kind: output, shape index: {}]  }
   0x1   :  { %15 = vsyncpa [#allocation6], 0 }
   0x2   :  { %16 = vsyncpa [#allocation4], 0  ;;  %s712_s30 = smov [#allocation2]   ;;  %s640_s13 = scalar_lea.hbm %s902_s5, 512 }
   0x3   :  { %s32_s10 = sshll.u32 %s712_s30, 4  ;;  %p641_p0 = scmp.ne.s32.totalorder %s902_s5, %s640_s13  ;;  %s33_s10 = int_to_ptr.vmem [resolvable:$true] %s32_s10 }
   0x4   :  { %p644_p1 = scmp.lt.u32.totalorder %s640_s13, %s902_s5 }
   0x6   :  { %p646_p2 = pnand %p644_p1, %p641_p0 }
   0x8   :  { %649 = shalt.err (!%p646_p2)
}
   0x9   :  { %s650_s18 = scalar_lea.vmem %s33_s10, 512  ;;  %p655_p4 = scmp.lt.s32.totalorder %s33_s10, %s33_s10 }
   0xa   :  { %p651_p3 = scmp.ne.s32.totalorder %s33_s10, %s650_s18  ;;  %p656_p5 = scmp.lt.s32.totalorder %s650_s18, %s650_s18 }
   0xc   :  { %p657_p6 = por %p656_p5, %p655_p4 }
   0xe   :  { %p658_p7 = pnand %p657_p6, %p651_p3 }
  0x10   :  { %661 = shalt.err (!%p658_p7)
}
  0x11   :  { %s713_s19 = smov 128   ;;  %s714_s20 = smov 8  }
  0x12   :  { %38 = dma.hbm_to_vmem [thread:$0]  %s902_s5, 512, %s33_s10, [#allocation3], %s713_s19, %s713_s19, %s714_s20  }
  0x13   :  { %s715_s23 = smov [#allocation5]   ;;  %s662_s27 = scalar_lea.hbm %s904_s7, 512 }
  0x14   :  { %s46_s24 = sshll.u32 %s715_s23, 4  ;;  %p663_p8 = scmp.ne.s32.totalorder %s904_s7, %s662_s27  ;;  %s47_s24 = int_to_ptr.vmem [resolvable:$true] %s46_s24 }
  0x15   :  { %p666_p9 = scmp.lt.u32.totalorder %s662_s27, %s904_s7 }
  0x17   :  { %p668_p10 = pnand %p666_p9, %p663_p8 }
  0x19   :  { %671 = shalt.err (!%p668_p10)
}
  0x1a   :  { %s672_s12 = scalar_lea.vmem %s47_s24, 512  ;;  %p677_p12 = scmp.lt.s32.totalorder %s47_s24, %s47_s24 }
  0x1b   :  { %p673_p11 = scmp.ne.s32.totalorder %s47_s24, %s672_s12  ;;  %p678_p13 = scmp.lt.s32.totalorder %s672_s12, %s672_s12 }
  0x1d   :  { %p679_p0 = por %p678_p13, %p677_p12 }
  0x1f   :  { %p680_p1 = pnand %p679_p0, %p673_p11 }
  0x21   :  { %683 = shalt.err (!%p680_p1)
}
  0x22   :  { %52 = dma.hbm_to_vmem [thread:$0]  %s904_s7, 512, %s47_s24, [#allocation6], %s713_s19, %s713_s19, %s714_s20  }
  0x23   :  { %706 = dma.done.wait [#allocation3], 512  }
  0x24   :  { %707 = vsyncadd [#allocation3], 4294966784 }
  0x25   :  { %708 = dma.done.wait [#allocation6], 512  }
  0x26   :  { %709 = vsyncadd [#allocation6], 4294966784  ;;  %v716_v0 = vmov 0.0   ;;  %vm717_vm0 = vmmov 0   ;;  %v718_v1 = vmov 0.0|0.0   ;;  %vm72_vm1 = vcmask 64512  }
  0x27   :  { %552 = vmatprep.subr.mxu0 %v716_v0  ;;  %554 = vmatprep.mubr.msk.f32.mxu0 %vm717_vm0, %v716_v0  ;;  %v64_v2 = vld [vmem:[%s898_s1] sm:$0xff]  ;;  %v172_v5 = vld [vmem:[%s900_s3 + $0x8] sm:$0xff]  ;;  %v63_v8 = vld [vmem:[%s897_s0 + $0x10] sm:$0xff]  ;;  %vm182_vm3 = vcmask 261120   ;;  %s719_s12 = smov [#allocation7]  }
  0x28   :  { %614 = vmatprep.subr.bf16.mxu1 %v718_v1  ;;  %571 = vmatprep.mubr.msk.f32.mxu1 %vm717_vm0, %v716_v0  ;;  %v61_v3 = vld [vmem:[%s897_s0] sm:$0xff]  ;;  %v62_v7 = vld [vmem:[%s897_s0 + $0x8] sm:$0xff]  ;;  %v173_v9 = vld [vmem:[%s900_s3 + $0x10] sm:$0xff]  ;;  %s498_s5 = sshll.u32 %s719_s12, 4  ;;  %s499_s5 = int_to_ptr.vmem [resolvable:$true] %s498_s5 }
  0x29   :  { %553 = vmatpush3.msra.mxu0 %v64_v2  ;;  %v171_v4 = vld [vmem:[%s900_s3] sm:$0xff]  ;;  %v174_v10 = vld [vmem:[%s900_s3 + $0x18] sm:$0xff]  ;;  %v282_v13 = vld [vmem:[#allocation2 + $0x8] sm:$0xff]  ;;  %s684_s10 = scalar_lea.vmem %s499_s5, 384  ;;  %p689_p3 = scmp.lt.s32.totalorder %s499_s5, %s499_s5 }
  0x2a   :  { %555 = vmatmul.mubr.msk.f32.vlgmr.msra.gmra.mrb[0].mxu0 %vm72_vm1, %v61_v3  ;;  %v615_v6 = vpack.c.bf16 %v172_v5, %v171_v4  ;;  %620 = vmatprep.subr.bf16.mxu0 %v718_v1  ;;  %v618_v11 = vpack.c.bf16 %v174_v10, %v173_v9  ;;  %v281_v12 = vld [vmem:[#allocation2] sm:$0xff]  ;;  %v283_v31 = vld [vmem:[#allocation2 + $0x10] sm:$0xff]  ;;  %v284_v32 = vld [vmem:[#allocation2 + $0x18] sm:$0xff]  ;;  %p685_p2 = scmp.ne.s32.totalorder %s499_s5, %s684_s10  ;;  %p690_p4 = scmp.lt.s32.totalorder %s684_s10, %s684_s10 }
  0x2b   :  { %557 = vmatprep.mubr.msk.f32.mxu0 %vm717_vm0, %v716_v0  ;;  %v621_v14 = vpack.c.bf16 %v282_v13, %v281_v12  ;;  %v511_v15 = vld [vmem:[%s899_s2] ss:$0 sm:$0xff]  ;;  %v624_v33 = vpack.c.bf16 %v284_v32, %v283_v31  ;;  %v391_v35 = vld [vmem:[#allocation5 + $0x8] sm:$0xff]  ;;  %v392_v53 = vld [vmem:[#allocation5 + $0x10] sm:$0xff] }
  0x2c   :  { %616 = vmatpush3.bf16.msra.mxu1 %v615_v6  ;;  %v390_v34 = vld [vmem:[#allocation5] sm:$0xff]  ;;  %v393_v54 = vld [vmem:[#allocation5 + $0x18] sm:$0xff]  ;;  %p691_p5 = por %p690_p4, %p689_p3 }
  0x2d   :  { %617 = vmatprep.subr.bf16.mxu1 %v718_v1  ;;  %622 = vmatpush3.bf16.msra.mxu0 %v621_v14  ;;  %v627_v36 = vpack.c.bf16 %v391_v35, %v390_v34  ;;  %v515_v37 = vld [vmem:[%s901_s4] ss:$0 sm:$0xff]  ;;  %v630_v55 = vpack.c.bf16 %v393_v54, %v392_v53 }
  0x2e   :  { %558 = vmatmul.mubr.msk.f32.gmra.mrb[2].mxu0 %vm72_vm1, %v62_v7  ;;  %623 = vmatprep.subr.bf16.mxu0 %v718_v1  ;;  %v519_v56 = vld [vmem:[%s903_s6] ss:$0 sm:$0xff]  ;;  %p692_p6 = pnand %p691_p5, %p685_p2 }
  0x2f   :  { %560 = vmatprep.mubr.msk.f32.mxu0 %vm717_vm0, %v716_v0  ;;  %v523_v9 = vld [vmem:[%s905_s8] ss:$0 sm:$0xff] }
  0x30   :  { %619 = vmatpush3.bf16.msra.mxu1 %v618_v11 }
  0x31   :  { %626 = vmatprep.subr.bf16.mxu1 %v718_v1  ;;  %625 = vmatpush3.bf16.msra.mxu0 %v624_v33 }
  0x32   :  { %561 = vmatmul.mubr.msk.f32.gmra.mrb[4].mxu0 %vm72_vm1, %v63_v8 }
  0x33   :  { %588 = vmatprep.mubr.msk.f32.mxu0 %vm717_vm0, %v716_v0 }
  0xfd   :  { %v148_v16 = vpop.f32.mrb[0].mxu0 }
  0xfe   :  { %v149_v17 = vadd.f32 %v511_v15, %v148_v16  ;;  %v556_v18 = vpop.f32.mrb[1].mxu0 }
 0x100   :  { %vm162_vm2 = vcmp.gt.f32.partialorder %v149_v17, 0.0  ;;  %v165_v19 = vmul.f32 0.2, %v149_v17 }
 0x101   :  { %v153_v20 = vpop.f32.mrb[2].mxu0 }
 0x102   :  { %v154_v21 = vadd.f32 %v511_v15, %v153_v20  ;;  %v559_v22 = vpop.f32.mrb[3].mxu0  ;;  %v168_v23 = vsel %vm162_vm2, %v149_v17, %v165_v19 }
 0x103   :  { %572 = vmatmul.mubr.msk.f32.vlgmr.msra.gmra.mrb[0].mxu1 %vm182_vm3, %v168_v23 }
 0x104   :  { %vm163_vm4 = vcmp.gt.f32.partialorder %v154_v21, 0.0  ;;  %v166_v24 = vmul.f32 0.2, %v154_v21  ;;  %574 = vmatprep.mubr.msk.f32.mxu1 %vm717_vm0, %v716_v0  ;;  %628 = vmatpush3.bf16.msra.mxu1 %v627_v36 }
 0x105   :  { %v158_v25 = vpop.f32.mrb[4].mxu0  ;;  %629 = vmatprep.subr.bf16.mxu1 %v718_v1 }
 0x106   :  { %v159_v26 = vadd.f32 %v511_v15, %v158_v25  ;;  %v562_v27 = vpop.f32.mrb[5].mxu0  ;;  %v169_v28 = vsel %vm163_vm4, %v154_v21, %v166_v24 }
 0x107   :  { %575 = vmatmul.mubr.msk.f32.gmra.mrb[2].mxu1 %vm182_vm3, %v169_v28 }
 0x108   :  { %vm164_vm5 = vcmp.gt.f32.partialorder %v159_v26, 0.0  ;;  %v167_v29 = vmul.f32 0.2, %v159_v26  ;;  %577 = vmatprep.mubr.msk.f32.mxu1 %vm717_vm0, %v716_v0  ;;  %631 = vmatpush3.bf16.msra.mxu1 %v630_v55 }
 0x10a   :  { %v170_v30 = vsel %vm164_vm5, %v159_v26, %v167_v29 }
 0x10b   :  { %578 = vmatmul.mubr.msk.f32.gmra.mrb[4].mxu1 %vm182_vm3, %v170_v30 }
 0x10c   :  { %605 = vmatprep.mubr.msk.f32.mxu1 %vm717_vm0, %v716_v0 }
 0x1d6   :  { %v258_v38 = vpop.f32.mrb[0].mxu1 }
 0x1d7   :  { %v259_v39 = vadd.f32 %v515_v37, %v258_v38  ;;  %v573_v40 = vpop.f32.mrb[1].mxu1 }
 0x1d9   :  { %vm272_vm6 = vcmp.gt.f32.partialorder %v259_v39, 0.0  ;;  %v275_v41 = vmul.f32 0.2, %v259_v39 }
 0x1da   :  { %v263_v42 = vpop.f32.mrb[2].mxu1 }
 0x1db   :  { %v278_v43 = vsel %vm272_vm6, %v259_v39, %v275_v41  ;;  %v264_v44 = vadd.f32 %v515_v37, %v263_v42  ;;  %v576_v45 = vpop.f32.mrb[3].mxu1 }
 0x1dc   :  { %589 = vmatmul.mubr.msk.f32.vlgmr.msra.gmra.mrb[6].mxu0 %vm182_vm3, %v278_v43 }
 0x1dd   :  { %vm273_vm7 = vcmp.gt.f32.partialorder %v264_v44, 0.0  ;;  %v276_v46 = vmul.f32 0.2, %v264_v44  ;;  %591 = vmatprep.mubr.msk.f32.mxu0 %vm717_vm0, %v716_v0 }
 0x1de   :  { %v268_v47 = vpop.f32.mrb[4].mxu1 }
 0x1df   :  { %v269_v48 = vadd.f32 %v515_v37, %v268_v47  ;;  %v579_v49 = vpop.f32.mrb[5].mxu1  ;;  %v279_v50 = vsel %vm273_vm7, %v264_v44, %v276_v46 }
 0x1e0   :  { %592 = vmatmul.mubr.msk.f32.gmra.mrb[8].mxu0 %vm182_vm3, %v279_v50 }
 0x1e1   :  { %vm274_vm8 = vcmp.gt.f32.partialorder %v269_v48, 0.0  ;;  %v277_v51 = vmul.f32 0.2, %v269_v48  ;;  %594 = vmatprep.mubr.msk.f32.mxu0 %vm717_vm0, %v716_v0 }
 0x1e3   :  { %v280_v52 = vsel %vm274_vm8, %v269_v48, %v277_v51 }
 0x1e4   :  { %595 = vmatmul.mubr.msk.f32.gmra.mrb[10].mxu0 %vm182_vm3, %v280_v52 }
 0x2af   :  { %v367_v57 = vpop.f32.mrb[6].mxu0 }
 0x2b0   :  { %v368_v58 = vadd.f32 %v519_v56, %v367_v57  ;;  %v590_v59 = vpop.f32.mrb[7].mxu0 }
 0x2b2   :  { %vm381_vm9 = vcmp.gt.f32.partialorder %v368_v58, 0.0  ;;  %v384_v60 = vmul.f32 0.2, %v368_v58 }
 0x2b3   :  { %v372_v61 = vpop.f32.mrb[8].mxu0 }
 0x2b4   :  { %v387_v62 = vsel %vm381_vm9, %v368_v58, %v384_v60  ;;  %v373_v63 = vadd.f32 %v519_v56, %v372_v61  ;;  %v593_v1 = vpop.f32.mrb[9].mxu0 }
 0x2b5   :  { %606 = vmatmul.mubr.msk.f32.vlgmr.msra.gmra.mrb[6].mxu1 %vm182_vm3, %v387_v62 }
 0x2b6   :  { %vm382_vm10 = vcmp.gt.f32.partialorder %v373_v63, 0.0  ;;  %v385_v2 = vmul.f32 0.2, %v373_v63  ;;  %608 = vmatprep.mubr.msk.f32.mxu1 %vm717_vm0, %v716_v0 }
 0x2b7   :  { %v377_v3 = vpop.f32.mrb[10].mxu0 }
 0x2b8   :  { %v378_v4 = vadd.f32 %v519_v56, %v377_v3  ;;  %v596_v5 = vpop.f32.mrb[11].mxu0  ;;  %v388_v6 = vsel %vm382_vm10, %v373_v63, %v385_v2 }
 0x2b9   :  { %609 = vmatmul.mubr.msk.f32.gmra.mrb[8].mxu1 %vm182_vm3, %v388_v6 }
 0x2ba   :  { %vm383_vm11 = vcmp.gt.f32.partialorder %v378_v4, 0.0  ;;  %v386_v7 = vmul.f32 0.2, %v378_v4  ;;  %611 = vmatprep.mubr.msk.f32.mxu1 %vm717_vm0, %v716_v0 }
 0x2bc   :  { %v389_v8 = vsel %vm383_vm11, %v378_v4, %v386_v7 }
 0x2bd   :  { %612 = vmatmul.mubr.msk.f32.gmra.mrb[10].mxu1 %vm182_vm3, %v389_v8 }
 0x388   :  { %v476_v10 = vpop.f32.mrb[6].mxu1 }
 0x389   :  { %v477_v11 = vadd.f32 %v523_v9, %v476_v10  ;;  %v607_v12 = vpop.f32.mrb[7].mxu1 }
 0x38b   :  { %490 = vst.msk [vmem:[#allocation7] sm:$0xff] %vm182_vm3, %v477_v11 }
 0x38c   :  { %v481_v13 = vpop.f32.mrb[8].mxu1 }
 0x38d   :  { %v482_v14 = vadd.f32 %v523_v9, %v481_v13  ;;  %v610_v15 = vpop.f32.mrb[9].mxu1 }
 0x38f   :  { %491 = vst.msk [vmem:[#allocation7 + $0x8] sm:$0xff] %vm182_vm3, %v482_v14 }
 0x390   :  { %v486_v0 = vpop.f32.mrb[10].mxu1 }
 0x391   :  { %v487_v16 = vadd.f32 %v523_v9, %v486_v0  ;;  %v613_v17 = vpop.f32.mrb[11].mxu1 }
 0x393   :  { %492 = vst.msk [vmem:[#allocation7 + $0x10] sm:$0xff] %vm182_vm3, %v487_v16 }
 0x394   :  { %695 = shalt.err (!%p692_p6)
}
 0x395   :  { %s696_s7 = scalar_lea.hbm %s906_s9, 384 }
 0x396   :  { %p697_p7 = scmp.ne.s32.totalorder %s906_s9, %s696_s7  ;;  %p700_p8 = scmp.lt.u32.totalorder %s696_s7, %s906_s9 }
 0x398   :  { %p702_p9 = pnand %p700_p8, %p697_p7 }
 0x39a   :  { %705 = shalt.err (!%p702_p9)
}
 0x39b   :  { %504 = dma.vmem_to_hbm [thread:$0]  %s499_s5, 384, %s906_s9, [#allocation4], %s713_s19, %s713_s19, %s714_s20  }
 0x39c   :  { %710 = dma.done.wait [#allocation4], 384  }
 0x39d   :  { %711 = vsyncadd [#allocation4], 4294966912 }
 0x39e   :  { %508 = vsyncpa [#allocation3], 1 }
 0x39f   :  { %509 = vsyncpa [#allocation6], 1 }
 0x3a0   :  { %510 = vsyncpa [#allocation4], 1 }

</bundles_post_ra>
